<compile_context>
chip_gen: v7x
topology: tpu7x:2x2x1
jax: 0.10.0
libtpu: 0.0.40
codegen_flags: <defaults>
</compile_context>

<pallas_src>
import math

import jax
import jax.numpy as jnp
from jax.experimental import pallas as pl
from jax.experimental.pallas import tpu as pltpu

LANE = 128


def _round_up(x, m):
    return ((x + m - 1) // m) * m


# ---------------------------------------------------------------------------
# Kernels
# ---------------------------------------------------------------------------
def _make_single_step_kernel(has_bias, has_relu):
    """Whole MLP in one grid step: refs = (x, W1^T, [b1], W2^T, [b2], ..., out)."""
    n_layers = len(has_bias)

    def kernel(*refs):
        idx = 0
        x_ref = refs[idx]
        idx += 1
        h = x_ref[...]
        for i in range(n_layers):
            w_ref = refs[idx]
            idx += 1
            h = jnp.dot(h, w_ref[...], preferred_element_type=jnp.float32)
            if has_bias[i]:
                h = h + refs[idx][...]
                idx += 1
            if has_relu[i]:
                h = jnp.maximum(h, 0.0)
        out_ref = refs[idx]
        out_ref[...] = h.astype(out_ref.dtype)

    return kernel


def _make_tiled_kernel(has_bias, has_relu, n_inputs):
    """First-layer contraction tiled over grid axis 0 with a VMEM accumulator;
    remaining (small, resident) layers run in the last-step epilogue so no
    intermediate activation ever touches HBM."""
    n_layers = len(has_bias)

    def kernel(*refs):
        x_ref, w1_ref = refs[0], refs[1]
        out_ref = refs[n_inputs]
        acc_ref = refs[n_inputs + 1]
        k = pl.program_id(0)

        @pl.when(k == 0)
        def _():
            acc_ref[...] = jnp.zeros_like(acc_ref)

        acc_ref[...] += jnp.dot(x_ref[...], w1_ref[...],
                                preferred_element_type=jnp.float32)

        @pl.when(k == pl.num_programs(0) - 1)
        def _():
            idx = 2
            h = acc_ref[...]
            if has_bias[0]:
                h = h + refs[idx][...]
                idx += 1
            if has_relu[0]:
                h = jnp.maximum(h, 0.0)
            for i in range(1, n_layers):
                w_ref = refs[idx]
                idx += 1
                h = jnp.dot(h, w_ref[...], preferred_element_type=jnp.float32)
                if has_bias[i]:
                    h = h + refs[idx][...]
                    idx += 1
                if has_relu[i]:
                    h = jnp.maximum(h, 0.0)
            out_ref[...] = h.astype(out_ref.dtype)

    return kernel


# ---------------------------------------------------------------------------
# Module wrapper
# ---------------------------------------------------------------------------
class ControDiscriNetPallas:
    def __init__(self, in_feats, hidden_feats, bias=True, key=None,
                 vmem_budget_bytes=24 << 20):
        assert len(hidden_feats) >= 1
        self.in_feats = int(in_feats)
        self.hidden_feats = list(hidden_feats)
        self.bias = bool(bias)
        self.vmem_budget = int(vmem_budget_bytes)
        key = jax.random.PRNGKey(0) if key is None else key

        dims = [self.in_feats] + self.hidden_feats
        n_layers = len(self.hidden_feats)
        self.n_layers = n_layers

        # Per-layer flags matching the PyTorch module:
        #  - last layer of a multi-layer stack: bias=False, no ReLU
        #  - single-layer stack: bias + ReLU (i == 0 branch)
        self.has_bias = [self.bias and not (n_layers > 1 and i == n_layers - 1)
                         for i in range(n_layers)]
        self.has_relu = [(n_layers == 1) or (i < n_layers - 1)
                         for i in range(n_layers)]

        # ----- parameters in PyTorch nn.Linear layout (out, in), float32 -----
        self.weights, self.biases = [], []
        for i in range(n_layers):
            key, kw, kb = jax.random.split(key, 3)
            fan_in, fan_out = dims[i], dims[i + 1]
            bound = 1.0 / math.sqrt(fan_in)          # nn.Linear default init
            W = jax.random.uniform(kw, (fan_out, fan_in), jnp.float32,
                                   -bound, bound)
            b = (jax.random.uniform(kb, (fan_out,), jnp.float32, -bound, bound)
                 if self.has_bias[i] else None)
            self.weights.append(W)
            self.biases.append(b)

        # ----- padded feature dims (lane-dense tiles) -------------------------
        self.h_pad = [_round_up(h, LANE) for h in self.hidden_feats]
        k_full = _round_up(self.in_feats, LANE)

        # Worst-case (double-buffered) VMEM footprint of the grid-invariant
        # operands + output; conservative so the no-pipeline_mode fallback fits.
        resident = 0
        if self.has_bias[0]:
            resident += 2 * 4 * self.h_pad[0]
        for i in range(1, n_layers):
            resident += 2 * 4 * self.h_pad[i - 1] * self.h_pad[i]
            if self.has_bias[i]:
                resident += 2 * 4 * self.h_pad[i]
        resident += 2 * 4 * self.h_pad[-1]                    # output block
        acc_bytes = 4 * self.h_pad[0]                         # f32 accumulator

        # ----- K tiling: prefer one full-K block, else big (>=2048) tiles -----
        single_bytes = (resident
                        + 2 * 4 * k_full * self.h_pad[0]      # W1^T (<=2 bufs)
                        + 2 * 4 * k_full)                     # x
        if single_bytes <= self.vmem_budget:
            self.tk, self.k_pad, self.n_ksteps = k_full, k_full, 1
            vmem_needed = single_bytes
        else:
            self.tk = None
            vmem_needed = None
            for cand in (4096, 2048, 1024, 512, 256, 128):
                need = (resident + acc_bytes
                        + 3 * 4 * cand * self.h_pad[0]        # W1^T, Buffered(3)
                        + 2 * 4 * cand)                       # x tile
                if need <= self.vmem_budget:
                    self.tk, vmem_needed = cand, need
                    break
            if self.tk is None:
                # TODO(synk): hidden layers this wide should be tiled over their
                # own grid axis instead of held fully resident in VMEM.
                self.tk = 128
                vmem_needed = (resident + acc_bytes
                               + 3 * 4 * 128 * self.h_pad[0] + 2 * 4 * 128)
            self.k_pad = _round_up(self.in_feats, self.tk)
            self.n_ksteps = self.k_pad // self.tk

        # Explicit, generation-safe scoped-VMEM cap (v7x physical = 64 MiB).
        self.vmem_limit = int(max(32 << 20, vmem_needed + (8 << 20)))

        # ----- padded, pre-transposed kernel parameters ------------------------
        # Zero padding keeps results exact; all-zero last-layer bias is dropped.
        params = []
        for i in range(n_layers):
            in_p = self.k_pad if i == 0 else self.h_pad[i - 1]
            out_p = self.h_pad[i]
            Wt = jnp.zeros((in_p, out_p), jnp.float32)
            Wt = Wt.at[:dims[i], :dims[i + 1]].set(self.weights[i].T)
            params.append(Wt)
            if self.has_bias[i]:
                bp = jnp.zeros((1, out_p), jnp.float32)
                bp = bp.at[0, :dims[i + 1]].set(self.biases[i])
                params.append(bp)
        self._params = tuple(params)

        # ----- build the fused, jitted forward ---------------------------------
        try:
            self._build(use_buffered=True)
            self._use_buffered = True
        except Exception:
            # pl.Buffered / pipeline_mode not available in this jax build.
            self._build(use_buffered=False)
            self._use_buffered = False

    # -----------------------------------------------------------------------
    def _build(self, use_buffered):
        n_layers = self.n_layers
        h_pad, tk, k_pad = self.h_pad, self.tk, self.k_pad
        multi = self.n_ksteps > 1

        def spec(shape, index_map, buffers):
            if use_buffered and buffers is not None:
                return pl.BlockSpec(shape, index_map,
                                    pipeline_mode=pl.Buffered(buffers))
            return pl.BlockSpec(shape, index_map)

        w1_buf = 3 if multi else 1       # streamed K tiles want pipeline depth 3
        x_buf = None if multi else 1     # default double-buffering when streamed

        in_specs = [
            spec((1, tk), lambda k: (0, k), x_buf),            # x K-tile
            spec((tk, h_pad[0]), lambda k: (k, 0), w1_buf),    # W1^T K-tile
        ]
        if self.has_bias[0]:
            in_specs.append(spec((1, h_pad[0]), lambda k: (0, 0), 1))
        for i in range(1, n_layers):
            in_specs.append(spec((h_pad[i - 1], h_pad[i]), lambda k: (0, 0), 1))
            if self.has_bias[i]:
                in_specs.append(spec((1, h_pad[i]), lambda k: (0, 0), 1))
        n_inputs = len(in_specs)

        out_specs = pl.BlockSpec((1, h_pad[-1]), lambda k: (0, 0))

        if multi:
            kernel = _make_tiled_kernel(self.has_bias, self.has_relu, n_inputs)
            scratch = [pltpu.VMEM((1, h_pad[0]), jnp.float32)]
        else:
            kernel = _make_single_step_kernel(self.has_bias, self.has_relu)
            scratch = []

        # Advisory cost estimate (HBM-stream-bound matvec).
        flops = 2 * k_pad * h_pad[0]
        bytes_accessed = 4 * (k_pad + k_pad * h_pad[0] + h_pad[-1])
        if self.has_bias[0]:
            bytes_accessed += 4 * h_pad[0]
        for i in range(1, n_layers):
            flops += 2 * h_pad[i - 1] * h_pad[i]
            bytes_accessed += 4 * h_pad[i - 1] * h_pad[i]
            if self.has_bias[i]:
                bytes_accessed += 4 * h_pad[i]

        forward = pl.pallas_call(
            kernel,
            out_shape=jax.ShapeDtypeStruct((1, h_pad[-1]), jnp.float32),
            grid_spec=pltpu.PrefetchScalarGridSpec(
                num_scalar_prefetch=0,
                grid=(self.n_ksteps,),
                in_specs=in_specs,
                out_specs=out_specs,
                scratch_shapes=scratch,
            ),
            compiler_params=pltpu.CompilerParams(
                dimension_semantics=("arbitrary",),
                vmem_limit_bytes=self.vmem_limit),
            cost_estimate=pl.CostEstimate(
                flops=flops, transcendentals=0, bytes_accessed=bytes_accessed),
        )

        k_extra = self.k_pad - self.in_feats
        out_feats = self.hidden_feats[-1]
        params_static = self._params  # keep arity stable across rebuilds

        def fwd(x_flat, *params):
            # pad -> fused kernel -> un-pad, all inside one jitted dispatch
            x_pad = jnp.pad(x_flat, ((0, 0), (0, k_extra)))
            out_pad = forward(x_pad, *params)
            return out_pad[:, :out_feats]

        del params_static
        self._jit_fwd = jax.jit(fwd)

    # -----------------------------------------------------------------------
    def __call__(self, force):
        x = jnp.asarray(force, jnp.float32).reshape(1, -1)
        assert x.shape[1] == self.in_feats, (x.shape, self.in_feats)
        try:
            return self._jit_fwd(x, *self._params)
        except Exception:
            if not self._use_buffered:
                raise
            # pipeline_mode=pl.Buffered rejected at lowering time on this
            # backend: rebuild with default buffering and retry once.
            self._use_buffered = False
            self._build(use_buffered=False)
            return self._jit_fwd(x, *self._params)


# ---------------------------------------------------------------------------
# Pure-JAX reference (same eval-mode semantics)
# ---------------------------------------------------------------------------
def _reference(net, force):
    h = jnp.asarray(force, jnp.float32).reshape(1, -1)
    for i, (W, b) in enumerate(zip(net.weights, net.biases)):
        h = h @ W.T
        if b is not None:
            h = h + b[None, :]
        if net.has_relu[i]:
            h = jnp.maximum(h, 0.0)
    return h


if __name__ == "__main__":
    key = jax.random.PRNGKey(0)
    ks = jax.random.split(key, 8)

    # 1) Small case: (8, 16) controversial-force block -> in_feats = 128.
    #    Single-step (full-K) path.
    force = jax.random.normal(ks[0], (8, 16), jnp.float32)
    net = ControDiscriNetPallas(128, [64, 32, 8], bias=True, key=ks[1])
    out = jax.block_until_ready(net(force))
    assert out.shape == (1, 8)
    assert jnp.allclose(out, _reference(net, force), atol=1e-4, rtol=1e-4)

    # 2) in_feats = 4096: still one full-K block (fits the 24 MiB VMEM budget),
    #    i.e. the step-overhead-bound 8-step grid is gone.
    force2 = jax.random.normal(ks[2], (64, 64), jnp.float32)
    net2 = ControDiscriNetPallas(4096, [128, 64, 16], bias=True, key=ks[3])
    out2 = jax.block_until_ready(net2(force2))
    assert net2.n_ksteps == 1
    assert out2.shape == (1, 16)
    assert jnp.allclose(out2, _reference(net2, force2), atol=1e-3, rtol=1e-3)

    # 3) Same shapes with an artificially tiny VMEM budget to exercise the
    #    tiled K-reduction path (accumulator + pl.when init/finalize).
    net3 = ControDiscriNetPallas(4096, [128, 64, 16], bias=True, key=ks[4],
                                 vmem_budget_bytes=2 << 20)
    out3 = jax.block_until_ready(net3(force2))
    assert net3.n_ksteps > 1
    assert jnp.allclose(out3, _reference(net3, force2), atol=1e-3, rtol=1e-3)

    # 4) Single-hidden-layer case: the lone layer keeps bias + ReLU
    #    (matches the PyTorch `i == 0` branch).
    force4 = jax.random.normal(ks[5], (8, 16), jnp.float32)
    net4 = ControDiscriNetPallas(128, [32], bias=True, key=ks[6])
    out4 = jax.block_until_ready(net4(force4))
    assert out4.shape == (1, 32)
    assert jnp.allclose(out4, _reference(net4, force4), atol=1e-4, rtol=1e-4)

    print("KERNEL_OK")
</pallas_src>

<mosaic_0001>
module attributes {stable_mosaic.version = 11 : i64} {
  func.func @kernel(%arg0: i32, %arg1: memref<1x128xf32, #tpu.memory_space<vmem>>, %arg2: memref<128x128xf32, #tpu.memory_space<vmem>>, %arg3: memref<1x128xf32, #tpu.memory_space<vmem>>, %arg4: memref<128x128xf32, #tpu.memory_space<vmem>>, %arg5: memref<1x128xf32, #tpu.memory_space<vmem>>, %arg6: memref<128x128xf32, #tpu.memory_space<vmem>>, %arg7: memref<1x128xf32, #tpu.memory_space<vmem>>) attributes {dimension_semantics = [#tpu.dimension_semantics<arbitrary>], iteration_bounds = array<i64: 1>, scalar_prefetch = 0 : i64, scratch_operands = 0 : i64, tpu.core_type = #tpu.core_type<tc>, window_params = [{pipeline_mode = #tpu.pipeline_mode<synchronous>, transform_indices = @transform_0, window_bounds = array<i64: 1, 128>}, {pipeline_mode = #tpu.pipeline_mode<synchronous>, transform_indices = @transform_1, window_bounds = array<i64: 128, 128>}, {pipeline_mode = #tpu.pipeline_mode<synchronous>, transform_indices = @transform_2, window_bounds = array<i64: 1, 128>}, {pipeline_mode = #tpu.pipeline_mode<synchronous>, transform_indices = @transform_3, window_bounds = array<i64: 128, 128>}, {pipeline_mode = #tpu.pipeline_mode<synchronous>, transform_indices = @transform_4, window_bounds = array<i64: 1, 128>}, {pipeline_mode = #tpu.pipeline_mode<synchronous>, transform_indices = @transform_5, window_bounds = array<i64: 128, 128>}, {pipeline_mode = #tpu.pipeline_mode<synchronous>, transform_indices = @transform_6, window_bounds = array<i64: 1, 128>}]} {
    %c0 = arith.constant 0 : index
    %c0_0 = arith.constant 0 : index
    %0 = vector.load %arg1[%c0, %c0_0] : memref<1x128xf32, #tpu.memory_space<vmem>>, vector<1x128xf32>
    %c0_1 = arith.constant 0 : index
    %c0_2 = arith.constant 0 : index
    %1 = vector.load %arg2[%c0_1, %c0_2] : memref<128x128xf32, #tpu.memory_space<vmem>>, vector<128x128xf32>
    %cst = arith.constant dense<0.000000e+00> : vector<1x128xf32>
    %2 = tpu.matmul %0, %1, %cst {dimension_numbers = #tpu.dot_dimension_numbers<[1], [0], [0], [1], [0, 0, 1, 1], [], []>} : vector<1x128xf32>, vector<128x128xf32>, vector<1x128xf32> -> vector<1x128xf32>
    %c0_3 = arith.constant 0 : index
    %c0_4 = arith.constant 0 : index
    %3 = vector.load %arg3[%c0_3, %c0_4] : memref<1x128xf32, #tpu.memory_space<vmem>>, vector<1x128xf32>
    %4 = arith.addf %2, %3 : vector<1x128xf32>
    %cst_5 = arith.constant 0.000000e+00 : f32
    %5 = vector.broadcast %cst_5 : f32 to vector<1x128xf32>
    %6 = arith.maximumf %4, %5 : vector<1x128xf32>
    %c0_6 = arith.constant 0 : index
    %c0_7 = arith.constant 0 : index
    %7 = vector.load %arg4[%c0_6, %c0_7] : memref<128x128xf32, #tpu.memory_space<vmem>>, vector<128x128xf32>
    %cst_8 = arith.constant dense<0.000000e+00> : vector<1x128xf32>
    %8 = tpu.matmul %6, %7, %cst_8 {dimension_numbers = #tpu.dot_dimension_numbers<[1], [0], [0], [1], [0, 0, 1, 1], [], []>} : vector<1x128xf32>, vector<128x128xf32>, vector<1x128xf32> -> vector<1x128xf32>
    %c0_9 = arith.constant 0 : index
    %c0_10 = arith.constant 0 : index
    %9 = vector.load %arg5[%c0_9, %c0_10] : memref<1x128xf32, #tpu.memory_space<vmem>>, vector<1x128xf32>
    %10 = arith.addf %8, %9 : vector<1x128xf32>
    %cst_11 = arith.constant 0.000000e+00 : f32
    %11 = vector.broadcast %cst_11 : f32 to vector<1x128xf32>
    %12 = arith.maximumf %10, %11 : vector<1x128xf32>
    %c0_12 = arith.constant 0 : index
    %c0_13 = arith.constant 0 : index
    %13 = vector.load %arg6[%c0_12, %c0_13] : memref<128x128xf32, #tpu.memory_space<vmem>>, vector<128x128xf32>
    %cst_14 = arith.constant dense<0.000000e+00> : vector<1x128xf32>
    %14 = tpu.matmul %12, %13, %cst_14 {dimension_numbers = #tpu.dot_dimension_numbers<[1], [0], [0], [1], [0, 0, 1, 1], [], []>} : vector<1x128xf32>, vector<128x128xf32>, vector<1x128xf32> -> vector<1x128xf32>
    %c0_15 = arith.constant 0 : index
    %c0_16 = arith.constant 0 : index
    %15 = vector.load %arg7[%c0_15, %c0_16] : memref<1x128xf32, #tpu.memory_space<vmem>>, vector<1x128xf32>
    tpu.vector_store %arg7[%c0_15, %c0_16], %14 {strides = array<i32>} : memref<1x128xf32, #tpu.memory_space<vmem>>, vector<1x128xf32>,
    return
  }
  func.func @transform_0(%arg0: i32) -> (i32, i32) {
    %c0_i32 = arith.constant 0 : i32
    %c0_i32_0 = arith.constant 0 : i32
    return %c0_i32, %arg0 : i32, i32
  }
  func.func @transform_1(%arg0: i32) -> (i32, i32) {
    %c0_i32 = arith.constant 0 : i32
    %c0_i32_0 = arith.constant 0 : i32
    return %arg0, %c0_i32 : i32, i32
  }
  func.func @transform_2(%arg0: i32) -> (i32, i32) {
    %c0_i32 = arith.constant 0 : i32
    %c0_i32_0 = arith.constant 0 : i32
    %c0_i32_1 = arith.constant 0 : i32
    return %c0_i32, %c0_i32_0 : i32, i32
  }
  func.func @transform_3(%arg0: i32) -> (i32, i32) {
    %c0_i32 = arith.constant 0 : i32
    %c0_i32_0 = arith.constant 0 : i32
    %c0_i32_1 = arith.constant 0 : i32
    return %c0_i32, %c0_i32_0 : i32, i32
  }
  func.func @transform_4(%arg0: i32) -> (i32, i32) {
    %c0_i32 = arith.constant 0 : i32
    %c0_i32_0 = arith.constant 0 : i32
    %c0_i32_1 = arith.constant 0 : i32
    return %c0_i32, %c0_i32_0 : i32, i32
  }
  func.func @transform_5(%arg0: i32) -> (i32, i32) {
    %c0_i32 = arith.constant 0 : i32
    %c0_i32_0 = arith.constant 0 : i32
    %c0_i32_1 = arith.constant 0 : i32
    return %c0_i32, %c0_i32_0 : i32, i32
  }
  func.func @transform_6(%arg0: i32) -> (i32, i32) {
    %c0_i32 = arith.constant 0 : i32
    %c0_i32_0 = arith.constant 0 : i32
    %c0_i32_1 = arith.constant 0 : i32
    return %c0_i32, %c0_i32_0 : i32, i32
  }
}

module attributes {stable_mosaic.version = 11 : i64} {
  func.func @kernel(%arg0: i32, %arg1: memref<1x128xf32, #tpu.memory_space<vmem>>, %arg2: memref<128x128xf32, #tpu.memory_space<vmem>>, %arg3: memref<1x128xf32, #tpu.memory_space<vmem>>, %arg4: memref<128x128xf32, #tpu.memory_space<vmem>>, %arg5: memref<1x128xf32, #tpu.memory_space<vmem>>, %arg6: memref<128x128xf32, #tpu.memory_space<vmem>>, %arg7: memref<1x128xf32, #tpu.memory_space<vmem>>) attributes {dimension_semantics = [#tpu.dimension_semantics<arbitrary>], iteration_bounds = array<i64: 1>, scalar_prefetch = 0 : i64, scratch_operands = 0 : i64, tpu.core_type = #tpu.core_type<tc>, window_params = [{transform_indices = @transform_0, window_bounds = array<i64: 1, 128>}, {transform_indices = @transform_1, window_bounds = array<i64: 128, 128>}, {pipeline_mode = #tpu.pipeline_mode<synchronous>, transform_indices = @transform_2, window_bounds = array<i64: 1, 128>}, {pipeline_mode = #tpu.pipeline_mode<synchronous>, transform_indices = @transform_3, window_bounds = array<i64: 128, 128>}, {pipeline_mode = #tpu.pipeline_mode<synchronous>, transform_indices = @transform_4, window_bounds = array<i64: 1, 128>}, {pipeline_mode = #tpu.pipeline_mode<synchronous>, transform_indices = @transform_5, window_bounds = array<i64: 128, 128>}, {pipeline_mode = #tpu.pipeline_mode<synchronous>, transform_indices = @transform_6, window_bounds = array<i64: 1, 128>}]} {
    %c0 = arith.constant 0 : index
    %c0_0 = arith.constant 0 : index
    %0 = vector.load %arg1[%c0, %c0_0] : memref<1x128xf32, #tpu.memory_space<vmem>>, vector<1x128xf32>
    %c0_1 = arith.constant 0 : index
    %c0_2 = arith.constant 0 : index
    %1 = vector.load %arg2[%c0_1, %c0_2] : memref<128x128xf32, #tpu.memory_space<vmem>>, vector<128x128xf32>
    %cst = arith.constant dense<0.000000e+00> : vector<1x128xf32>
    %2 = tpu.matmul %0, %1, %cst {dimension_numbers = #tpu.dot_dimension_numbers<[1], [0], [0], [1], [0, 0, 1, 1], [], []>} : vector<1x128xf32>, vector<128x128xf32>, vector<1x128xf32> -> vector<1x128xf32>
    %c0_3 = arith.constant 0 : index
    %c0_4 = arith.constant 0 : index
    %3 = vector.load %arg3[%c0_3, %c0_4] : memref<1x128xf32, #tpu.memory_space<vmem>>, vector<1x128xf32>
    %4 = arith.addf %2, %3 : vector<1x128xf32>
    %cst_5 = arith.constant 0.000000e+00 : f32
    %5 = vector.broadcast %cst_5 : f32 to vector<1x128xf32>
    %6 = arith.maximumf %4, %5 : vector<1x128xf32>
    %c0_6 = arith.constant 0 : index
    %c0_7 = arith.constant 0 : index
    %7 = vector.load %arg4[%c0_6, %c0_7] : memref<128x128xf32, #tpu.memory_space<vmem>>, vector<128x128xf32>
    %cst_8 = arith.constant dense<0.000000e+00> : vector<1x128xf32>
    %8 = tpu.matmul %6, %7, %cst_8 {dimension_numbers = #tpu.dot_dimension_numbers<[1], [0], [0], [1], [0, 0, 1, 1], [], []>} : vector<1x128xf32>, vector<128x128xf32>, vector<1x128xf32> -> vector<1x128xf32>
    %c0_9 = arith.constant 0 : index
    %c0_10 = arith.constant 0 : index
    %9 = vector.load %arg5[%c0_9, %c0_10] : memref<1x128xf32, #tpu.memory_space<vmem>>, vector<1x128xf32>
    %10 = arith.addf %8, %9 : vector<1x128xf32>
    %cst_11 = arith.constant 0.000000e+00 : f32
    %11 = vector.broadcast %cst_11 : f32 to vector<1x128xf32>
    %12 = arith.maximumf %10, %11 : vector<1x128xf32>
    %c0_12 = arith.constant 0 : index
    %c0_13 = arith.constant 0 : index
    %13 = vector.load %arg6[%c0_12, %c0_13] : memref<128x128xf32, #tpu.memory_space<vmem>>, vector<128x128xf32>
    %cst_14 = arith.constant dense<0.000000e+00> : vector<1x128xf32>
    %14 = tpu.matmul %12, %13, %cst_14 {dimension_numbers = #tpu.dot_dimension_numbers<[1], [0], [0], [1], [0, 0, 1, 1], [], []>} : vector<1x128xf32>, vector<128x128xf32>, vector<1x128xf32> -> vector<1x128xf32>
    %c0_15 = arith.constant 0 : index
    %c0_16 = arith.constant 0 : index
    %15 = vector.load %arg7[%c0_15, %c0_16] : memref<1x128xf32, #tpu.memory_space<vmem>>, vector<1x128xf32>
    tpu.vector_store %arg7[%c0_15, %c0_16], %14 {strides = array<i32>} : memref<1x128xf32, #tpu.memory_space<vmem>>, vector<1x128xf32>,
    return
  }
  func.func @transform_0(%arg0: i32) -> (i32, i32) {
    %c0_i32 = arith.constant 0 : i32
    %c0_i32_0 = arith.constant 0 : i32
    return %c0_i32, %arg0 : i32, i32
  }
  func.func @transform_1(%arg0: i32) -> (i32, i32) {
    %c0_i32 = arith.constant 0 : i32
    %c0_i32_0 = arith.constant 0 : i32
    return %arg0, %c0_i32 : i32, i32
  }
  func.func @transform_2(%arg0: i32) -> (i32, i32) {
    %c0_i32 = arith.constant 0 : i32
    %c0_i32_0 = arith.constant 0 : i32
    %c0_i32_1 = arith.constant 0 : i32
    return %c0_i32, %c0_i32_0 : i32, i32
  }
  func.func @transform_3(%arg0: i32) -> (i32, i32) {
    %c0_i32 = arith.constant 0 : i32
    %c0_i32_0 = arith.constant 0 : i32
    %c0_i32_1 = arith.constant 0 : i32
    return %c0_i32, %c0_i32_0 : i32, i32
  }
  func.func @transform_4(%arg0: i32) -> (i32, i32) {
    %c0_i32 = arith.constant 0 : i32
    %c0_i32_0 = arith.constant 0 : i32
    %c0_i32_1 = arith.constant 0 : i32
    return %c0_i32, %c0_i32_0 : i32, i32
  }
  func.func @transform_5(%arg0: i32) -> (i32, i32) {
    %c0_i32 = arith.constant 0 : i32
    %c0_i32_0 = arith.constant 0 : i32
    %c0_i32_1 = arith.constant 0 : i32
    return %c0_i32, %c0_i32_0 : i32, i32
  }
  func.func @transform_6(%arg0: i32) -> (i32, i32) {
    %c0_i32 = arith.constant 0 : i32
    %c0_i32_0 = arith.constant 0 : i32
    %c0_i32_1 = arith.constant 0 : i32
    return %c0_i32, %c0_i32_0 : i32, i32
  }
}

</mosaic_0001>

<bundles_post_ra>
// kernel: fwd.1
= control target key start
LH: loop header
LB: loop body
LE: loop exit
PB: predicated region body
PF: predicated region fallthrough
CT: control target
= control target key end

     0   :  { %11 = vsyncpa [#allocation3], 0  ;;  %s864_s0 = inlined_call_operand.hbm [shape: f32[1,128], index: 0, kind: input, shape index: {}]   ;;  %s865_s1 = inlined_call_operand.hbm [shape: f32[128,128], index: 1, kind: input, shape index: {}]   ;;  %s866_s2 = inlined_call_operand.vmem [shape: f32[1,128], index: 2, kind: input, shape index: {}]   ;;  %s867_s3 = inlined_call_operand.hbm [shape: f32[128,128], index: 3, kind: input, shape index: {}]   ;;  %s868_s4 = inlined_call_operand.vmem [shape: f32[1,128], index: 4, kind: input, shape index: {}]   ;;  %s869_s5 = inlined_call_operand.hbm [shape: f32[128,128], index: 5, kind: input, shape index: {}]   ;;  %s870_s6 = inlined_call_operand.hbm [shape: f32[1,128], index: 6, kind: output, shape index: {}]  }
   0x1   :  { %12 = vsyncpa [#allocation6], 0 }
   0x2   :  { %13 = vsyncpa [#allocation9], 0 }
   0x3   :  { %14 = vsyncpa [#allocation4], 0  ;;  %s714_s21 = smov [#allocation5]   ;;  %s596_s25 = scalar_lea.hbm %s865_s1, 2048 }
   0x4   :  { %s30_s22 = sshll.u32 %s714_s21, 4  ;;  %p597_p0 = scmp.ne.s32.totalorder %s865_s1, %s596_s25  ;;  %s31_s22 = int_to_ptr.vmem [resolvable:$true] %s30_s22 }
   0x5   :  { %p600_p1 = scmp.lt.u32.totalorder %s596_s25, %s865_s1 }
   0x7   :  { %p602_p2 = pnand %p600_p1, %p597_p0 }
   0x9   :  { %605 = shalt.err (!%p602_p2)
}
   0xa   :  { %s606_s30 = scalar_lea.vmem %s31_s22, 2048  ;;  %p611_p4 = scmp.lt.s32.totalorder %s31_s22, %s31_s22 }
   0xb   :  { %p607_p3 = scmp.ne.s32.totalorder %s31_s22, %s606_s30  ;;  %p612_p5 = scmp.lt.s32.totalorder %s606_s30, %s606_s30 }
   0xd   :  { %p613_p6 = por %p612_p5, %p611_p4 }
   0xf   :  { %p614_p7 = pnand %p613_p6, %p607_p3 }
  0x11   :  { %617 = shalt.err (!%p614_p7)
}
  0x12   :  { %s715_s7 = smov 128   ;;  %s716_s8 = smov 8  }
  0x13   :  { %36 = dma.hbm_to_vmem [thread:$0]  %s865_s1, 2048, %s31_s22, [#allocation6], %s715_s7, %s715_s7, %s716_s8  }
  0x14   :  { %s717_s11 = smov [#allocation2]   ;;  %s718_s13 = smov [#allocation7]  }
  0x15   :  { %s21_s12 = sshll.u32 %s717_s11, 4  ;;  %s44_s14 = sshll.u32 %s718_s13, 4  ;;  %s22_s12 = int_to_ptr.vmem [resolvable:$true] %s21_s12  ;;  %s45_s14 = int_to_ptr.vmem [resolvable:$true] %s44_s14 }
  0x16   :  { %s618_s17 = scalar_lea.hbm %s864_s0, 16 }
  0x17   :  { %p619_p8 = scmp.ne.s32.totalorder %s864_s0, %s618_s17  ;;  %p622_p9 = scmp.lt.u32.totalorder %s618_s17, %s864_s0 }
  0x19   :  { %p624_p10 = pnand %p622_p9, %p619_p8 }
  0x1b   :  { %627 = shalt.err (!%p624_p10)
}
  0x1c   :  { %s628_s1 = scalar_lea.vmem %s22_s12, 16  ;;  %s632_s22 = scalar_lea.vmem %s22_s12, 32 }
  0x1d   :  { %p629_p11 = scmp.ne.s32.totalorder %s22_s12, %s628_s1  ;;  %p633_p12 = scmp.lt.s32.totalorder %s22_s12, %s22_s12 }
  0x1e   :  { %p634_p13 = scmp.lt.s32.totalorder %s632_s22, %s628_s1 }
  0x20   :  { %p635_p0 = por %p634_p13, %p633_p12 }
  0x22   :  { %p636_p1 = pnand %p635_p0, %p629_p11 }
  0x24   :  { %639 = shalt.err (!%p636_p1)
}
  0x25   :  { %24 = dma.hbm_to_vmem [thread:$0]  %s864_s0, 16, %s22_s12, [#allocation3]  }
  0x26   :  { %s640_s27 = scalar_lea.hbm %s867_s3, 2048 }
  0x27   :  { %p641_p2 = scmp.ne.s32.totalorder %s867_s3, %s640_s27  ;;  %p644_p3 = scmp.lt.u32.totalorder %s640_s27, %s867_s3 }
  0x29   :  { %p646_p4 = pnand %p644_p3, %p641_p2 }
  0x2b   :  { %649 = shalt.err (!%p646_p4)
}
  0x2c   :  { %s650_s10 = scalar_lea.vmem %s45_s14, 2048  ;;  %p655_p6 = scmp.lt.s32.totalorder %s45_s14, %s45_s14 }
  0x2d   :  { %p651_p5 = scmp.ne.s32.totalorder %s45_s14, %s650_s10  ;;  %p656_p7 = scmp.lt.s32.totalorder %s650_s10, %s650_s10 }
  0x2f   :  { %p657_p8 = por %p656_p7, %p655_p6 }
  0x31   :  { %p658_p9 = pnand %p657_p8, %p651_p5 }
  0x33   :  { %661 = shalt.err (!%p658_p9)
}
  0x34   :  { %50 = dma.hbm_to_vmem [thread:$0]  %s867_s3, 2048, %s45_s14, [#allocation6], %s715_s7, %s715_s7, %s716_s8  }
  0x35   :  { %s719_s12 = smov [#allocation8]   ;;  %s662_s17 = scalar_lea.hbm %s869_s5, 2048 }
  0x36   :  { %s58_s13 = sshll.u32 %s719_s12, 4  ;;  %p663_p10 = scmp.ne.s32.totalorder %s869_s5, %s662_s17  ;;  %s59_s13 = int_to_ptr.vmem [resolvable:$true] %s58_s13 }
  0x37   :  { %p666_p11 = scmp.lt.u32.totalorder %s662_s17, %s869_s5 }
  0x39   :  { %p668_p12 = pnand %p666_p11, %p663_p10 }
  0x3b   :  { %671 = shalt.err (!%p668_p12)
}
  0x3c   :  { %s672_s1 = scalar_lea.vmem %s59_s13, 2048  ;;  %p677_p0 = scmp.lt.s32.totalorder %s59_s13, %s59_s13 }
  0x3d   :  { %p673_p13 = scmp.ne.s32.totalorder %s59_s13, %s672_s1  ;;  %p678_p1 = scmp.lt.s32.totalorder %s672_s1, %s672_s1 }
  0x3f   :  { %p679_p2 = por %p678_p1, %p677_p0 }
  0x41   :  { %p680_p3 = pnand %p679_p2, %p673_p13 }
  0x43   :  { %683 = shalt.err (!%p680_p3)
}
  0x44   :  { %64 = dma.hbm_to_vmem [thread:$0]  %s869_s5, 2048, %s59_s13, [#allocation9], %s715_s7, %s715_s7, %s716_s8  }
  0x45   :  { %706 = dma.done.wait [#allocation3], 16  }
  0x46   :  { %707 = vsyncadd [#allocation3], 4294967280 }
  0x47   :  { %708 = dma.done.wait [#allocation6], 4096  }
  0x48   :  { %709 = vsyncadd [#allocation6], 4294963200 }
  0x49   :  { %710 = dma.done.wait [#allocation9], 2048  }
  0x4a   :  { %711 = vsyncadd [#allocation9], 4294965248  ;;  %v720_v0 = vmov 0.0|0.0   ;;  %vm721_vm0 = vmmov 0   ;;  %v722_v1 = vmov 0.0   ;;  %v78_v2 = vld [vmem:[#allocation5] sm:$0xff] }
  0x4b   :  { %514 = vmatprep.subr.bf16.mxu0 %v720_v0  ;;  %441 = vmatprep.mubr.msk.f32.mxu0 %vm721_vm0, %v722_v1  ;;  %v79_v3 = vld [vmem:[#allocation5 + $0x8] sm:$0xff]  ;;  %v80_v4 = vld [vmem:[#allocation5 + $0x10] sm:$0xff]  ;;  %v81_v6 = vld [vmem:[#allocation5 + $0x18] sm:$0xff]  ;;  %s723_s23 = smov [#allocation10]  }
  0x4c   :  { %538 = vmatprep.subr.bf16.mxu1 %v720_v0  ;;  %476 = vmatprep.mubr.msk.f32.mxu1 %vm721_vm0, %v722_v1  ;;  %v515_v5 = vpack.c.bf16 %v79_v3, %v78_v2  ;;  %v518_v7 = vpack.c.bf16 %v81_v6, %v80_v4  ;;  %v82_v8 = vld [vmem:[#allocation5 + $0x20] sm:$0xff]  ;;  %v83_v9 = vld [vmem:[#allocation5 + $0x28] sm:$0xff]  ;;  %v168_v12 = vld [vmem:[#allocation7 + $0x10] sm:$0xff] }
  0x4d   :  { %v166_v10 = vld [vmem:[#allocation7] sm:$0xff]  ;;  %v167_v11 = vld [vmem:[#allocation7 + $0x8] sm:$0xff]  ;;  %v169_v13 = vld [vmem:[#allocation7 + $0x18] sm:$0xff]  ;;  %v521_v14 = vpack.c.bf16 %v83_v9, %v82_v8 }
  0x4e   :  { %516 = vmatpush3.bf16.msra.mxu0 %v515_v5  ;;  %v539_v15 = vpack.c.bf16 %v167_v11, %v166_v10  ;;  %v84_v16 = vld [vmem:[#allocation5 + $0x30] sm:$0xff]  ;;  %v85_v17 = vld [vmem:[#allocation5 + $0x38] sm:$0xff]  ;;  %v542_v18 = vpack.c.bf16 %v169_v13, %v168_v12  ;;  %v170_v19 = vld [vmem:[#allocation7 + $0x20] sm:$0xff] }
  0x4f   :  { %517 = vmatprep.subr.bf16.mxu0 %v720_v0  ;;  %v171_v20 = vld [vmem:[#allocation7 + $0x28] sm:$0xff]  ;;  %v524_v21 = vpack.c.bf16 %v85_v17, %v84_v16  ;;  %v86_v22 = vld [vmem:[#allocation5 + $0x40] sm:$0xff]  ;;  %v172_v25 = vld [vmem:[#allocation7 + $0x30] sm:$0xff] }
  0x50   :  { %540 = vmatpush3.bf16.msra.mxu1 %v539_v15  ;;  %v87_v23 = vld [vmem:[#allocation5 + $0x48] sm:$0xff]  ;;  %v545_v24 = vpack.c.bf16 %v171_v20, %v170_v19  ;;  %v173_v26 = vld [vmem:[#allocation7 + $0x38] sm:$0xff]  ;;  %v88_v28 = vld [vmem:[#allocation5 + $0x50] sm:$0xff] }
  0x51   :  { %541 = vmatprep.subr.bf16.mxu1 %v720_v0  ;;  %v527_v27 = vpack.c.bf16 %v87_v23, %v86_v22  ;;  %v89_v29 = vld [vmem:[#allocation5 + $0x58] sm:$0xff]  ;;  %v548_v30 = vpack.c.bf16 %v173_v26, %v172_v25  ;;  %v174_v31 = vld [vmem:[#allocation7 + $0x40] sm:$0xff]  ;;  %v175_v32 = vld [vmem:[#allocation7 + $0x48] sm:$0xff] }
  0x52   :  { %519 = vmatpush3.bf16.msra.mxu0 %v518_v7  ;;  %v530_v33 = vpack.c.bf16 %v89_v29, %v88_v28  ;;  %v90_v34 = vld [vmem:[#allocation5 + $0x60] sm:$0xff]  ;;  %v91_v35 = vld [vmem:[#allocation5 + $0x68] sm:$0xff]  ;;  %v551_v36 = vpack.c.bf16 %v175_v32, %v174_v31  ;;  %v176_v37 = vld [vmem:[#allocation7 + $0x50] sm:$0xff] }
  0x53   :  { %520 = vmatprep.subr.bf16.mxu0 %v720_v0  ;;  %v177_v38 = vld [vmem:[#allocation7 + $0x58] sm:$0xff]  ;;  %v533_v39 = vpack.c.bf16 %v91_v35, %v90_v34  ;;  %v92_v40 = vld [vmem:[#allocation5 + $0x70] sm:$0xff]  ;;  %v178_v43 = vld [vmem:[#allocation7 + $0x60] sm:$0xff] }
  0x54   :  { %543 = vmatpush3.bf16.msra.mxu1 %v542_v18  ;;  %v93_v41 = vld [vmem:[#allocation5 + $0x78] sm:$0xff]  ;;  %v554_v42 = vpack.c.bf16 %v177_v38, %v176_v37  ;;  %v179_v44 = vld [vmem:[#allocation7 + $0x68] sm:$0xff]  ;;  %v180_v48 = vld [vmem:[#allocation7 + $0x70] sm:$0xff] }
  0x55   :  { %544 = vmatprep.subr.bf16.mxu1 %v720_v0  ;;  %v536_v45 = vpack.c.bf16 %v93_v41, %v92_v40  ;;  %v557_v46 = vpack.c.bf16 %v179_v44, %v178_v43  ;;  %v77_v47 = vld [vmem:[#allocation2] sm:$0x1]  ;;  %v254_v51 = vld [vmem:[#allocation8] sm:$0xff]  ;;  %v255_v52 = vld [vmem:[#allocation8 + $0x8] sm:$0xff] }
  0x56   :  { %522 = vmatpush3.bf16.msra.mxu0 %v521_v14  ;;  %v181_v49 = vld [vmem:[#allocation7 + $0x78] sm:$0xff]  ;;  %v256_v53 = vld [vmem:[#allocation8 + $0x10] sm:$0xff]  ;;  %v563_v54 = vpack.c.bf16 %v255_v52, %v254_v51  ;;  %v258_v57 = vld [vmem:[#allocation8 + $0x20] sm:$0xff] }
  0x57   :  { %523 = vmatprep.subr.bf16.mxu0 %v720_v0  ;;  %v560_v50 = vpack.c.bf16 %v181_v49, %v180_v48  ;;  %v257_v55 = vld [vmem:[#allocation8 + $0x18] sm:$0xff]  ;;  %v259_v58 = vld [vmem:[#allocation8 + $0x28] sm:$0xff]  ;;  %v260_v60 = vld [vmem:[#allocation8 + $0x30] sm:$0xff] }
  0x58   :  { %546 = vmatpush3.bf16.msra.mxu1 %v545_v24  ;;  %v566_v56 = vpack.c.bf16 %v257_v55, %v256_v53  ;;  %v569_v59 = vpack.c.bf16 %v259_v58, %v258_v57  ;;  %v261_v61 = vld [vmem:[#allocation8 + $0x38] sm:$0xff]  ;;  %v262_v63 = vld [vmem:[#allocation8 + $0x40] sm:$0xff]  ;;  %v264_v3 = vld [vmem:[#allocation8 + $0x50] sm:$0xff] }
  0x59   :  { %547 = vmatprep.subr.bf16.mxu1 %v720_v0  ;;  %v572_v62 = vpack.c.bf16 %v261_v61, %v260_v60  ;;  %v265_v4 = vld [vmem:[#allocation8 + $0x58] sm:$0xff]  ;;  %v266_v6 = vld [vmem:[#allocation8 + $0x60] sm:$0xff]  ;;  %v267_v7 = vld [vmem:[#allocation8 + $0x68] sm:$0xff] }
  0x5a   :  { %525 = vmatpush3.bf16.msra.mxu0 %v524_v21  ;;  %v578_v5 = vpack.c.bf16 %v265_v4, %v264_v3  ;;  %v581_v8 = vpack.c.bf16 %v267_v7, %v266_v6  ;;  %v94_v9 = vld [vmem:[%s866_s2] sm:$0x1]  ;;  %v268_v14 = vld [vmem:[#allocation8 + $0x70] sm:$0xff]  ;;  %s347_s2 = sshll.u32 %s723_s23, 4  ;;  %s348_s2 = int_to_ptr.vmem [resolvable:$true] %s347_s2 }
  0x5b   :  { %526 = vmatprep.subr.bf16.mxu0 %v720_v0  ;;  %v269_v15 = vld [vmem:[#allocation8 + $0x78] sm:$0xff]  ;;  %s684_s24 = scalar_lea.vmem %s348_s2, 16  ;;  %s688_s25 = scalar_lea.vmem %s348_s2, 32 }
  0x5c   :  { %549 = vmatpush3.bf16.msra.mxu1 %v548_v30  ;;  %v584_v16 = vpack.c.bf16 %v269_v15, %v268_v14  ;;  %v182_v17 = vld [vmem:[%s868_s4] sm:$0x1]  ;;  %p685_p4 = scmp.ne.s32.totalorder %s348_s2, %s684_s24  ;;  %p689_p5 = scmp.lt.s32.totalorder %s348_s2, %s348_s2 }
  0x5d   :  { %550 = vmatprep.subr.bf16.mxu1 %v720_v0  ;;  %p690_p6 = scmp.lt.s32.totalorder %s688_s25, %s684_s24 }
  0x5e   :  { %528 = vmatpush3.bf16.msra.mxu0 %v527_v27 }
  0x5f   :  { %529 = vmatprep.subr.bf16.mxu0 %v720_v0  ;;  %p691_p7 = por %p690_p6, %p689_p5 }
  0x60   :  { %552 = vmatpush3.bf16.msra.mxu1 %v551_v36 }
  0x61   :  { %553 = vmatprep.subr.bf16.mxu1 %v720_v0  ;;  %p692_p8 = pnand %p691_p7, %p685_p4 }
  0x62   :  { %531 = vmatpush3.bf16.msra.mxu0 %v530_v33 }
  0x63   :  { %532 = vmatprep.subr.bf16.mxu0 %v720_v0 }
  0x64   :  { %555 = vmatpush3.bf16.msra.mxu1 %v554_v42 }
  0x65   :  { %556 = vmatprep.subr.bf16.mxu1 %v720_v0 }
  0x66   :  { %534 = vmatpush3.bf16.msra.mxu0 %v533_v39 }
  0x67   :  { %535 = vmatprep.subr.bf16.mxu0 %v720_v0 }
  0x68   :  { %558 = vmatpush3.bf16.msra.mxu1 %v557_v46 }
  0x69   :  { %559 = vmatprep.subr.bf16.mxu1 %v720_v0 }
  0x6a   :  { %537 = vmatpush3.bf16.msra.mxu0 %v536_v45 }
  0x6b   :  { %562 = vmatprep.subr.bf16.mxu0 %v720_v0 }
  0x6c   :  { %561 = vmatpush3.bf16.msra.mxu1 %v560_v50 }
  0x6d   :  { %442 = vmatmul.mubr.f32.vlgmr.msra.gmra.mrb[0].mxu0 %v77_v47 }
  0x6e   :  { %511 = vmatprep.mubr.msk.f32.mxu0 %vm721_vm0, %v722_v1  ;;  %564 = vmatpush3.bf16.msra.mxu0 %v563_v54  ;;  %v263_v1 = vld [vmem:[#allocation8 + $0x48] sm:$0xff] }
  0x6f   :  { %565 = vmatprep.subr.bf16.mxu0 %v720_v0  ;;  %v575_v2 = vpack.c.bf16 %v263_v1, %v262_v63 }
  0x72   :  { %567 = vmatpush3.bf16.msra.mxu0 %v566_v56 }
  0x73   :  { %568 = vmatprep.subr.bf16.mxu0 %v720_v0 }
  0x76   :  { %570 = vmatpush3.bf16.msra.mxu0 %v569_v59 }
  0x77   :  { %571 = vmatprep.subr.bf16.mxu0 %v720_v0 }
  0x7a   :  { %573 = vmatpush3.bf16.msra.mxu0 %v572_v62 }
  0x7b   :  { %574 = vmatprep.subr.bf16.mxu0 %v720_v0 }
  0x7e   :  { %576 = vmatpush3.bf16.msra.mxu0 %v575_v2 }
  0x7f   :  { %577 = vmatprep.subr.bf16.mxu0 %v720_v0 }
  0x82   :  { %579 = vmatpush3.bf16.msra.mxu0 %v578_v5 }
  0x83   :  { %580 = vmatprep.subr.bf16.mxu0 %v720_v0 }
  0x86   :  { %582 = vmatpush3.bf16.msra.mxu0 %v581_v8 }
  0x87   :  { %583 = vmatprep.subr.bf16.mxu0 %v720_v0 }
  0x8a   :  { %585 = vmatpush3.bf16.msra.mxu0 %v584_v16 }
 0x140   :  { %v161_v10 = vpop.f32.mrb[0].mxu0 }
 0x141   :  { %v162_v11 = vadd.f32 %v161_v10, %v94_v9  ;;  %v443_v12 = vpop.f32.mrb[1].mxu0 }
 0x143   :  { %v165_v13 = vmax.f32 %v162_v11, 0.0 }
 0x145   :  { %477 = vmatmul.mubr.f32.vlgmr.msra.gmra.mrb[0].mxu1 %v165_v13 }
 0x218   :  { %v249_v18 = vpop.f32.mrb[0].mxu1 }
 0x219   :  { %v250_v19 = vadd.f32 %v249_v18, %v182_v17  ;;  %v478_v0 = vpop.f32.mrb[1].mxu1 }
 0x21b   :  { %v253_v20 = vmax.f32 %v250_v19, 0.0 }
 0x21d   :  { %512 = vmatmul.mubr.f32.vlgmr.msra.gmra.mrb[2].mxu0 %v253_v20 }
 0x2f0   :  { %v336_v21 = vpop.f32.mrb[2].mxu0 }
 0x2f1   :  { %340 = vst [vmem:[#allocation10] sm:$0x1] %v336_v21  ;;  %v513_v22 = vpop.f32.mrb[3].mxu0 }
 0x2f2   :  { %695 = shalt.err (!%p692_p8)
}
 0x2f3   :  { %s696_s27 = scalar_lea.hbm %s870_s6, 16 }
 0x2f4   :  { %p697_p9 = scmp.ne.s32.totalorder %s870_s6, %s696_s27  ;;  %p700_p10 = scmp.lt.u32.totalorder %s696_s27, %s870_s6 }
 0x2f6   :  { %p702_p11 = pnand %p700_p10, %p697_p9 }
 0x2f8   :  { %705 = shalt.err (!%p702_p11)
}
 0x2f9   :  { %350 = dma.vmem_to_hbm [thread:$0]  %s348_s2, 16, %s870_s6, [#allocation4]  }
 0x2fa   :  { %712 = dma.done.wait [#allocation4], 16  }
 0x2fb   :  { %713 = vsyncadd [#allocation4], 4294967280 }
 0x2fc   :  { %354 = vsyncpa [#allocation3], 1 }
 0x2fd   :  { %355 = vsyncpa [#allocation6], 1 }
 0x2fe   :  { %356 = vsyncpa [#allocation9], 1 }
 0x2ff   :  { %357 = vsyncpa [#allocation4], 1 }

// kernel: fwd.1
= control target key start
LH: loop header
LB: loop body
LE: loop exit
PB: predicated region body
PF: predicated region fallthrough
CT: control target
= control target key end

     0   :  { %11 = vsyncpa [#allocation3], 0  ;;  %s864_s0 = inlined_call_operand.hbm [shape: f32[1,128], index: 0, kind: input, shape index: {}]   ;;  %s865_s1 = inlined_call_operand.hbm [shape: f32[128,128], index: 1, kind: input, shape index: {}]   ;;  %s866_s2 = inlined_call_operand.vmem [shape: f32[1,128], index: 2, kind: input, shape index: {}]   ;;  %s867_s3 = inlined_call_operand.hbm [shape: f32[128,128], index: 3, kind: input, shape index: {}]   ;;  %s868_s4 = inlined_call_operand.vmem [shape: f32[1,128], index: 4, kind: input, shape index: {}]   ;;  %s869_s5 = inlined_call_operand.hbm [shape: f32[128,128], index: 5, kind: input, shape index: {}]   ;;  %s870_s6 = inlined_call_operand.hbm [shape: f32[1,128], index: 6, kind: output, shape index: {}]  }
   0x1   :  { %12 = vsyncpa [#allocation6], 0 }
   0x2   :  { %13 = vsyncpa [#allocation9], 0 }
   0x3   :  { %14 = vsyncpa [#allocation4], 0  ;;  %s714_s21 = smov [#allocation5]   ;;  %s596_s25 = scalar_lea.hbm %s865_s1, 2048 }
   0x4   :  { %s30_s22 = sshll.u32 %s714_s21, 4  ;;  %p597_p0 = scmp.ne.s32.totalorder %s865_s1, %s596_s25  ;;  %s31_s22 = int_to_ptr.vmem [resolvable:$true] %s30_s22 }
   0x5   :  { %p600_p1 = scmp.lt.u32.totalorder %s596_s25, %s865_s1 }
   0x7   :  { %p602_p2 = pnand %p600_p1, %p597_p0 }
   0x9   :  { %605 = shalt.err (!%p602_p2)
}
   0xa   :  { %s606_s30 = scalar_lea.vmem %s31_s22, 2048  ;;  %p611_p4 = scmp.lt.s32.totalorder %s31_s22, %s31_s22 }
   0xb   :  { %p607_p3 = scmp.ne.s32.totalorder %s31_s22, %s606_s30  ;;  %p612_p5 = scmp.lt.s32.totalorder %s606_s30, %s606_s30 }
   0xd   :  { %p613_p6 = por %p612_p5, %p611_p4 }
   0xf   :  { %p614_p7 = pnand %p613_p6, %p607_p3 }
  0x11   :  { %617 = shalt.err (!%p614_p7)
}
  0x12   :  { %s715_s7 = smov 128   ;;  %s716_s8 = smov 8  }
  0x13   :  { %36 = dma.hbm_to_vmem [thread:$0]  %s865_s1, 2048, %s31_s22, [#allocation6], %s715_s7, %s715_s7, %s716_s8  }
  0x14   :  { %s717_s11 = smov [#allocation2]   ;;  %s718_s13 = smov [#allocation7]  }
  0x15   :  { %s21_s12 = sshll.u32 %s717_s11, 4  ;;  %s44_s14 = sshll.u32 %s718_s13, 4  ;;  %s22_s12 = int_to_ptr.vmem [resolvable:$true] %s21_s12  ;;  %s45_s14 = int_to_ptr.vmem [resolvable:$true] %s44_s14 }
  0x16   :  { %s618_s17 = scalar_lea.hbm %s864_s0, 16 }
  0x17   :  { %p619_p8 = scmp.ne.s32.totalorder %s864_s0, %s618_s17  ;;  %p622_p9 = scmp.lt.u32.totalorder %s618_s17, %s864_s0 }
  0x19   :  { %p624_p10 = pnand %p622_p9, %p619_p8 }
  0x1b   :  { %627 = shalt.err (!%p624_p10)
}
  0x1c   :  { %s628_s1 = scalar_lea.vmem %s22_s12, 16  ;;  %s632_s22 = scalar_lea.vmem %s22_s12, 32 }
  0x1d   :  { %p629_p11 = scmp.ne.s32.totalorder %s22_s12, %s628_s1  ;;  %p633_p12 = scmp.lt.s32.totalorder %s22_s12, %s22_s12 }
  0x1e   :  { %p634_p13 = scmp.lt.s32.totalorder %s632_s22, %s628_s1 }
  0x20   :  { %p635_p0 = por %p634_p13, %p633_p12 }
  0x22   :  { %p636_p1 = pnand %p635_p0, %p629_p11 }
  0x24   :  { %639 = shalt.err (!%p636_p1)
}
  0x25   :  { %24 = dma.hbm_to_vmem [thread:$0]  %s864_s0, 16, %s22_s12, [#allocation3]  }
  0x26   :  { %s640_s27 = scalar_lea.hbm %s867_s3, 2048 }
  0x27   :  { %p641_p2 = scmp.ne.s32.totalorder %s867_s3, %s640_s27  ;;  %p644_p3 = scmp.lt.u32.totalorder %s640_s27, %s867_s3 }
  0x29   :  { %p646_p4 = pnand %p644_p3, %p641_p2 }
  0x2b   :  { %649 = shalt.err (!%p646_p4)
}
  0x2c   :  { %s650_s10 = scalar_lea.vmem %s45_s14, 2048  ;;  %p655_p6 = scmp.lt.s32.totalorder %s45_s14, %s45_s14 }
  0x2d   :  { %p651_p5 = scmp.ne.s32.totalorder %s45_s14, %s650_s10  ;;  %p656_p7 = scmp.lt.s32.totalorder %s650_s10, %s650_s10 }
  0x2f   :  { %p657_p8 = por %p656_p7, %p655_p6 }
  0x31   :  { %p658_p9 = pnand %p657_p8, %p651_p5 }
  0x33   :  { %661 = shalt.err (!%p658_p9)
}
  0x34   :  { %50 = dma.hbm_to_vmem [thread:$0]  %s867_s3, 2048, %s45_s14, [#allocation6], %s715_s7, %s715_s7, %s716_s8  }
  0x35   :  { %s719_s12 = smov [#allocation8]   ;;  %s662_s17 = scalar_lea.hbm %s869_s5, 2048 }
  0x36   :  { %s58_s13 = sshll.u32 %s719_s12, 4  ;;  %p663_p10 = scmp.ne.s32.totalorder %s869_s5, %s662_s17  ;;  %s59_s13 = int_to_ptr.vmem [resolvable:$true] %s58_s13 }
  0x37   :  { %p666_p11 = scmp.lt.u32.totalorder %s662_s17, %s869_s5 }
  0x39   :  { %p668_p12 = pnand %p666_p11, %p663_p10 }
  0x3b   :  { %671 = shalt.err (!%p668_p12)
}
  0x3c   :  { %s672_s1 = scalar_lea.vmem %s59_s13, 2048  ;;  %p677_p0 = scmp.lt.s32.totalorder %s59_s13, %s59_s13 }
  0x3d   :  { %p673_p13 = scmp.ne.s32.totalorder %s59_s13, %s672_s1  ;;  %p678_p1 = scmp.lt.s32.totalorder %s672_s1, %s672_s1 }
  0x3f   :  { %p679_p2 = por %p678_p1, %p677_p0 }
  0x41   :  { %p680_p3 = pnand %p679_p2, %p673_p13 }
  0x43   :  { %683 = shalt.err (!%p680_p3)
}
  0x44   :  { %64 = dma.hbm_to_vmem [thread:$0]  %s869_s5, 2048, %s59_s13, [#allocation9], %s715_s7, %s715_s7, %s716_s8  }
  0x45   :  { %706 = dma.done.wait [#allocation3], 16  }
  0x46   :  { %707 = vsyncadd [#allocation3], 4294967280 }
  0x47   :  { %708 = dma.done.wait [#allocation6], 4096  }
  0x48   :  { %709 = vsyncadd [#allocation6], 4294963200 }
  0x49   :  { %710 = dma.done.wait [#allocation9], 2048  }
  0x4a   :  { %711 = vsyncadd [#allocation9], 4294965248  ;;  %v720_v0 = vmov 0.0|0.0   ;;  %vm721_vm0 = vmmov 0   ;;  %v722_v1 = vmov 0.0   ;;  %v78_v2 = vld [vmem:[#allocation5] sm:$0xff] }
  0x4b   :  { %514 = vmatprep.subr.bf16.mxu0 %v720_v0  ;;  %441 = vmatprep.mubr.msk.f32.mxu0 %vm721_vm0, %v722_v1  ;;  %v79_v3 = vld [vmem:[#allocation5 + $0x8] sm:$0xff]  ;;  %v80_v4 = vld [vmem:[#allocation5 + $0x10] sm:$0xff]  ;;  %v81_v6 = vld [vmem:[#allocation5 + $0x18] sm:$0xff]  ;;  %s723_s23 = smov [#allocation10]  }
  0x4c   :  { %538 = vmatprep.subr.bf16.mxu1 %v720_v0  ;;  %476 = vmatprep.mubr.msk.f32.mxu1 %vm721_vm0, %v722_v1  ;;  %v515_v5 = vpack.c.bf16 %v79_v3, %v78_v2  ;;  %v518_v7 = vpack.c.bf16 %v81_v6, %v80_v4  ;;  %v82_v8 = vld [vmem:[#allocation5 + $0x20] sm:$0xff]  ;;  %v83_v9 = vld [vmem:[#allocation5 + $0x28] sm:$0xff]  ;;  %v168_v12 = vld [vmem:[#allocation7 + $0x10] sm:$0xff] }
  0x4d   :  { %v166_v10 = vld [vmem:[#allocation7] sm:$0xff]  ;;  %v167_v11 = vld [vmem:[#allocation7 + $0x8] sm:$0xff]  ;;  %v169_v13 = vld [vmem:[#allocation7 + $0x18] sm:$0xff]  ;;  %v521_v14 = vpack.c.bf16 %v83_v9, %v82_v8 }
  0x4e   :  { %516 = vmatpush3.bf16.msra.mxu0 %v515_v5  ;;  %v539_v15 = vpack.c.bf16 %v167_v11, %v166_v10  ;;  %v84_v16 = vld [vmem:[#allocation5 + $0x30] sm:$0xff]  ;;  %v85_v17 = vld [vmem:[#allocation5 + $0x38] sm:$0xff]  ;;  %v542_v18 = vpack.c.bf16 %v169_v13, %v168_v12  ;;  %v170_v19 = vld [vmem:[#allocation7 + $0x20] sm:$0xff] }
  0x4f   :  { %517 = vmatprep.subr.bf16.mxu0 %v720_v0  ;;  %v171_v20 = vld [vmem:[#allocation7 + $0x28] sm:$0xff]  ;;  %v524_v21 = vpack.c.bf16 %v85_v17, %v84_v16  ;;  %v86_v22 = vld [vmem:[#allocation5 + $0x40] sm:$0xff]  ;;  %v172_v25 = vld [vmem:[#allocation7 + $0x30] sm:$0xff] }
  0x50   :  { %540 = vmatpush3.bf16.msra.mxu1 %v539_v15  ;;  %v87_v23 = vld [vmem:[#allocation5 + $0x48] sm:$0xff]  ;;  %v545_v24 = vpack.c.bf16 %v171_v20, %v170_v19  ;;  %v173_v26 = vld [vmem:[#allocation7 + $0x38] sm:$0xff]  ;;  %v88_v28 = vld [vmem:[#allocation5 + $0x50] sm:$0xff] }
  0x51   :  { %541 = vmatprep.subr.bf16.mxu1 %v720_v0  ;;  %v527_v27 = vpack.c.bf16 %v87_v23, %v86_v22  ;;  %v89_v29 = vld [vmem:[#allocation5 + $0x58] sm:$0xff]  ;;  %v548_v30 = vpack.c.bf16 %v173_v26, %v172_v25  ;;  %v174_v31 = vld [vmem:[#allocation7 + $0x40] sm:$0xff]  ;;  %v175_v32 = vld [vmem:[#allocation7 + $0x48] sm:$0xff] }
  0x52   :  { %519 = vmatpush3.bf16.msra.mxu0 %v518_v7  ;;  %v530_v33 = vpack.c.bf16 %v89_v29, %v88_v28  ;;  %v90_v34 = vld [vmem:[#allocation5 + $0x60] sm:$0xff]  ;;  %v91_v35 = vld [vmem:[#allocation5 + $0x68] sm:$0xff]  ;;  %v551_v36 = vpack.c.bf16 %v175_v32, %v174_v31  ;;  %v176_v37 = vld [vmem:[#allocation7 + $0x50] sm:$0xff] }
  0x53   :  { %520 = vmatprep.subr.bf16.mxu0 %v720_v0  ;;  %v177_v38 = vld [vmem:[#allocation7 + $0x58] sm:$0xff]  ;;  %v533_v39 = vpack.c.bf16 %v91_v35, %v90_v34  ;;  %v92_v40 = vld [vmem:[#allocation5 + $0x70] sm:$0xff]  ;;  %v178_v43 = vld [vmem:[#allocation7 + $0x60] sm:$0xff] }
  0x54   :  { %543 = vmatpush3.bf16.msra.mxu1 %v542_v18  ;;  %v93_v41 = vld [vmem:[#allocation5 + $0x78] sm:$0xff]  ;;  %v554_v42 = vpack.c.bf16 %v177_v38, %v176_v37  ;;  %v179_v44 = vld [vmem:[#allocation7 + $0x68] sm:$0xff]  ;;  %v180_v48 = vld [vmem:[#allocation7 + $0x70] sm:$0xff] }
  0x55   :  { %544 = vmatprep.subr.bf16.mxu1 %v720_v0  ;;  %v536_v45 = vpack.c.bf16 %v93_v41, %v92_v40  ;;  %v557_v46 = vpack.c.bf16 %v179_v44, %v178_v43  ;;  %v77_v47 = vld [vmem:[#allocation2] sm:$0x1]  ;;  %v254_v51 = vld [vmem:[#allocation8] sm:$0xff]  ;;  %v255_v52 = vld [vmem:[#allocation8 + $0x8] sm:$0xff] }
  0x56   :  { %522 = vmatpush3.bf16.msra.mxu0 %v521_v14  ;;  %v181_v49 = vld [vmem:[#allocation7 + $0x78] sm:$0xff]  ;;  %v256_v53 = vld [vmem:[#allocation8 + $0x10] sm:$0xff]  ;;  %v563_v54 = vpack.c.bf16 %v255_v52, %v254_v51  ;;  %v258_v57 = vld [vmem:[#allocation8 + $0x20] sm:$0xff] }
  0x57   :  { %523 = vmatprep.subr.bf16.mxu0 %v720_v0  ;;  %v560_v50 = vpack.c.bf16 %v181_v49, %v180_v48  ;;  %v257_v55 = vld [vmem:[#allocation8 + $0x18] sm:$0xff]  ;;  %v259_v58 = vld [vmem:[#allocation8 + $0x28] sm:$0xff]  ;;  %v260_v60 = vld [vmem:[#allocation8 + $0x30] sm:$0xff] }
  0x58   :  { %546 = vmatpush3.bf16.msra.mxu1 %v545_v24  ;;  %v566_v56 = vpack.c.bf16 %v257_v55, %v256_v53  ;;  %v569_v59 = vpack.c.bf16 %v259_v58, %v258_v57  ;;  %v261_v61 = vld [vmem:[#allocation8 + $0x38] sm:$0xff]  ;;  %v262_v63 = vld [vmem:[#allocation8 + $0x40] sm:$0xff]  ;;  %v264_v3 = vld [vmem:[#allocation8 + $0x50] sm:$0xff] }
  0x59   :  { %547 = vmatprep.subr.bf16.mxu1 %v720_v0  ;;  %v572_v62 = vpack.c.bf16 %v261_v61, %v260_v60  ;;  %v265_v4 = vld [vmem:[#allocation8 + $0x58] sm:$0xff]  ;;  %v266_v6 = vld [vmem:[#allocation8 + $0x60] sm:$0xff]  ;;  %v267_v7 = vld [vmem:[#allocation8 + $0x68] sm:$0xff] }
  0x5a   :  { %525 = vmatpush3.bf16.msra.mxu0 %v524_v21  ;;  %v578_v5 = vpack.c.bf16 %v265_v4, %v264_v3  ;;  %v581_v8 = vpack.c.bf16 %v267_v7, %v266_v6  ;;  %v94_v9 = vld [vmem:[%s866_s2] sm:$0x1]  ;;  %v268_v14 = vld [vmem:[#allocation8 + $0x70] sm:$0xff]  ;;  %s347_s2 = sshll.u32 %s723_s23, 4  ;;  %s348_s2 = int_to_ptr.vmem [resolvable:$true] %s347_s2 }
  0x5b   :  { %526 = vmatprep.subr.bf16.mxu0 %v720_v0  ;;  %v269_v15 = vld [vmem:[#allocation8 + $0x78] sm:$0xff]  ;;  %s684_s24 = scalar_lea.vmem %s348_s2, 16  ;;  %s688_s25 = scalar_lea.vmem %s348_s2, 32 }
  0x5c   :  { %549 = vmatpush3.bf16.msra.mxu1 %v548_v30  ;;  %v584_v16 = vpack.c.bf16 %v269_v15, %v268_v14  ;;  %v182_v17 = vld [vmem:[%s868_s4] sm:$0x1]  ;;  %p685_p4 = scmp.ne.s32.totalorder %s348_s2, %s684_s24  ;;  %p689_p5 = scmp.lt.s32.totalorder %s348_s2, %s348_s2 }
  0x5d   :  { %550 = vmatprep.subr.bf16.mxu1 %v720_v0  ;;  %p690_p6 = scmp.lt.s32.totalorder %s688_s25, %s684_s24 }
  0x5e   :  { %528 = vmatpush3.bf16.msra.mxu0 %v527_v27 }
  0x5f   :  { %529 = vmatprep.subr.bf16.mxu0 %v720_v0  ;;  %p691_p7 = por %p690_p6, %p689_p5 }
  0x60   :  { %552 = vmatpush3.bf16.msra.mxu1 %v551_v36 }
  0x61   :  { %553 = vmatprep.subr.bf16.mxu1 %v720_v0  ;;  %p692_p8 = pnand %p691_p7, %p685_p4 }
  0x62   :  { %531 = vmatpush3.bf16.msra.mxu0 %v530_v33 }
  0x63   :  { %532 = vmatprep.subr.bf16.mxu0 %v720_v0 }
  0x64   :  { %555 = vmatpush3.bf16.msra.mxu1 %v554_v42 }
  0x65   :  { %556 = vmatprep.subr.bf16.mxu1 %v720_v0 }
  0x66   :  { %534 = vmatpush3.bf16.msra.mxu0 %v533_v39 }
  0x67   :  { %535 = vmatprep.subr.bf16.mxu0 %v720_v0 }
  0x68   :  { %558 = vmatpush3.bf16.msra.mxu1 %v557_v46 }
  0x69   :  { %559 = vmatprep.subr.bf16.mxu1 %v720_v0 }
  0x6a   :  { %537 = vmatpush3.bf16.msra.mxu0 %v536_v45 }
  0x6b   :  { %562 = vmatprep.subr.bf16.mxu0 %v720_v0 }
  0x6c   :  { %561 = vmatpush3.bf16.msra.mxu1 %v560_v50 }
  0x6d   :  { %442 = vmatmul.mubr.f32.vlgmr.msra.gmra.mrb[0].mxu0 %v77_v47 }
  0x6e   :  { %511 = vmatprep.mubr.msk.f32.mxu0 %vm721_vm0, %v722_v1  ;;  %564 = vmatpush3.bf16.msra.mxu0 %v563_v54  ;;  %v263_v1 = vld [vmem:[#allocation8 + $0x48] sm:$0xff] }
  0x6f   :  { %565 = vmatprep.subr.bf16.mxu0 %v720_v0  ;;  %v575_v2 = vpack.c.bf16 %v263_v1, %v262_v63 }
  0x72   :  { %567 = vmatpush3.bf16.msra.mxu0 %v566_v56 }
  0x73   :  { %568 = vmatprep.subr.bf16.mxu0 %v720_v0 }
  0x76   :  { %570 = vmatpush3.bf16.msra.mxu0 %v569_v59 }
  0x77   :  { %571 = vmatprep.subr.bf16.mxu0 %v720_v0 }
  0x7a   :  { %573 = vmatpush3.bf16.msra.mxu0 %v572_v62 }
  0x7b   :  { %574 = vmatprep.subr.bf16.mxu0 %v720_v0 }
  0x7e   :  { %576 = vmatpush3.bf16.msra.mxu0 %v575_v2 }
  0x7f   :  { %577 = vmatprep.subr.bf16.mxu0 %v720_v0 }
  0x82   :  { %579 = vmatpush3.bf16.msra.mxu0 %v578_v5 }
  0x83   :  { %580 = vmatprep.subr.bf16.mxu0 %v720_v0 }
  0x86   :  { %582 = vmatpush3.bf16.msra.mxu0 %v581_v8 }
  0x87   :  { %583 = vmatprep.subr.bf16.mxu0 %v720_v0 }
  0x8a   :  { %585 = vmatpush3.bf16.msra.mxu0 %v584_v16 }
 0x140   :  { %v161_v10 = vpop.f32.mrb[0].mxu0 }
 0x141   :  { %v162_v11 = vadd.f32 %v161_v10, %v94_v9  ;;  %v443_v12 = vpop.f32.mrb[1].mxu0 }
 0x143   :  { %v165_v13 = vmax.f32 %v162_v11, 0.0 }
 0x145   :  { %477 = vmatmul.mubr.f32.vlgmr.msra.gmra.mrb[0].mxu1 %v165_v13 }
 0x218   :  { %v249_v18 = vpop.f32.mrb[0].mxu1 }
 0x219   :  { %v250_v19 = vadd.f32 %v249_v18, %v182_v17  ;;  %v478_v0 = vpop.f32.mrb[1].mxu1 }
 0x21b   :  { %v253_v20 = vmax.f32 %v250_v19, 0.0 }
 0x21d   :  { %512 = vmatmul.mubr.f32.vlgmr.msra.gmra.mrb[2].mxu0 %v253_v20 }
 0x2f0   :  { %v336_v21 = vpop.f32.mrb[2].mxu0 }
 0x2f1   :  { %340 = vst [vmem:[#allocation10] sm:$0x1] %v336_v21  ;;  %v513_v22 = vpop.f32.mrb[3].mxu0 }
 0x2f2   :  { %695 = shalt.err (!%p692_p8)
}
 0x2f3   :  { %s696_s27 = scalar_lea.hbm %s870_s6, 16 }
 0x2f4   :  { %p697_p9 = scmp.ne.s32.totalorder %s870_s6, %s696_s27  ;;  %p700_p10 = scmp.lt.u32.totalorder %s696_s27, %s870_s6 }
 0x2f6   :  { %p702_p11 = pnand %p700_p10, %p697_p9 }
 0x2f8   :  { %705 = shalt.err (!%p702_p11)
}
 0x2f9   :  { %350 = dma.vmem_to_hbm [thread:$0]  %s348_s2, 16, %s870_s6, [#allocation4]  }
 0x2fa   :  { %712 = dma.done.wait [#allocation4], 16  }
 0x2fb   :  { %713 = vsyncadd [#allocation4], 4294967280 }
 0x2fc   :  { %354 = vsyncpa [#allocation3], 1 }
 0x2fd   :  { %355 = vsyncpa [#allocation6], 1 }
 0x2fe   :  { %356 = vsyncpa [#allocation9], 1 }
 0x2ff   :  { %357 = vsyncpa [#allocation4], 1 }

</bundles_post_ra>
